<compile_context>
chip_gen: v7x
topology: tpu7x:2x2x1
jax: 0.10.0
libtpu: 0.0.40
codegen_flags: <defaults>
</compile_context>

<pallas_src>
import functools

import jax
import jax.numpy as jnp
from jax.experimental import pallas as pl
from jax.experimental.pallas import tpu as pltpu


def _linear_leaky(x_ref, w_ref, b_ref, negative_slope):
    # Linear: y = x @ W_t + b  (MXU, f32 accumulation)
    y = jnp.dot(x_ref[...], w_ref[...], preferred_element_type=jnp.float32)
    y = y + b_ref[...]                      # (1, TN) broadcasts over batch rows
    # LeakyReLU(0.2)
    return jnp.where(y >= 0, y, negative_slope * y)


def _decoder_block_eval_kernel(x_ref, w_ref, b_ref, o_ref, *, negative_slope):
    y = _linear_leaky(x_ref, w_ref, b_ref, negative_slope)
    o_ref[...] = y.astype(o_ref.dtype)


def _decoder_block_train_kernel(x_ref, w_ref, b_ref, bits_ref, o_ref, *,
                                negative_slope, keep_prob):
    y = _linear_leaky(x_ref, w_ref, b_ref, negative_slope)
    # Inverted dropout via integer threshold: bits ~ U[0, 2^24),
    # keep iff bits < keep_prob * 2^24  (1 cmp + 1 select + 1 mul per element).
    thresh = jnp.int32(int(keep_prob * (1 << 24)))
    keep = bits_ref[...] < thresh
    o_ref[...] = jnp.where(keep, y * (1.0 / keep_prob), 0.0).astype(o_ref.dtype)


def _round_up(x, m):
    return ((x + m - 1) // m) * m


def _vmem_bytes(tb, tn, in_dim, has_bits):
    # Double-buffered f32/i32 tiles: x, W_t, bias, (bits), out.
    words = tb * in_dim + in_dim * tn + tn + tb * tn
    if has_bits:
        words += tb * tn
    return 2 * words * 4


def decoder_block(x, w_t, b, *, do_rate=0.1, training=False, rng_key=None):
    """x: [B, in_dim] f32, w_t: [in_dim, out_dim] f32 (PyTorch weight^T), b: [out_dim] f32."""
    B, in_dim = x.shape
    out_dim = w_t.shape[1]
    keep_prob = 1.0 - float(do_rate)
    has_bits = training and keep_prob < 1.0

    # --- tile sizes: lane-dense output, VMEM-budgeted (fits v7x's 64 MiB) ---
    TB = min(_round_up(B, 8), 512)
    TN = min(_round_up(out_dim, 128), 512)
    budget = 28 * 1024 * 1024
    while _vmem_bytes(TB, TN, in_dim, has_bits) > budget and TB > 8:
        TB = max(8, _round_up(TB // 2, 8))
    while _vmem_bytes(TB, TN, in_dim, has_bits) > budget and TN > 128:
        TN = max(128, _round_up(TN // 2, 128))
    B_pad = _round_up(B, TB)
    N_pad = _round_up(out_dim, TN)

    # --- pad operands (zero padding is inert through matmul / LeakyReLU) ---
    x_p = jnp.pad(x, ((0, B_pad - B), (0, 0)))
    w_p = jnp.pad(w_t, ((0, 0), (0, N_pad - out_dim)))
    b_p = jnp.pad(b, (0, N_pad - out_dim)).reshape(1, N_pad)

    in_specs = [
        pl.BlockSpec((TB, in_dim), lambda n, i: (i, 0)),   # x: batch-tiled
        pl.BlockSpec((in_dim, TN), lambda n, i: (0, n)),   # W_t: resident per n-tile
        pl.BlockSpec((1, TN), lambda n, i: (0, n)),        # bias
    ]
    inputs = [x_p, w_p, b_p]

    if has_bits:
        if rng_key is None:
            rng_key = jax.random.PRNGKey(0)
        bits = jax.random.randint(rng_key, (B_pad, N_pad), 0, 1 << 24,
                                  dtype=jnp.int32)
        in_specs.append(pl.BlockSpec((TB, TN), lambda n, i: (i, n)))
        inputs.append(bits)
        kernel = functools.partial(_decoder_block_train_kernel,
                                   negative_slope=0.2, keep_prob=keep_prob)
    else:
        kernel = functools.partial(_decoder_block_eval_kernel,
                                   negative_slope=0.2)

    out = pl.pallas_call(
        kernel,
        out_shape=jax.ShapeDtypeStruct((B_pad, N_pad), jnp.float32),
        grid_spec=pltpu.PrefetchScalarGridSpec(
            num_scalar_prefetch=0,
            grid=(N_pad // TN, B_pad // TB),   # out_dim outer (weight reuse), batch inner
            in_specs=in_specs,
            out_specs=pl.BlockSpec((TB, TN), lambda n, i: (i, n)),
        ),
        compiler_params=pltpu.CompilerParams(
            dimension_semantics=("parallel", "parallel"),
            vmem_limit_bytes=48 * 1024 * 1024,
        ),
    )(*inputs)

    return out[:B, :out_dim]


if __name__ == "__main__":
    # Small shapes implied by the module: batch=8, in_dim=32, out_dim=64.
    B, in_dim, out_dim = 8, 32, 64
    do_rate = 0.1

    key = jax.random.PRNGKey(0)
    kx, kw, kb, kd = jax.random.split(key, 4)

    x = jax.random.normal(kx, (B, in_dim), dtype=jnp.float32)
    # PyTorch Linear weight is (out_dim, in_dim); the kernel takes its transpose.
    w = jax.random.normal(kw, (out_dim, in_dim), dtype=jnp.float32) / jnp.sqrt(float(in_dim))
    w_t = w.T
    b = jax.random.normal(kb, (out_dim,), dtype=jnp.float32) * 0.01

    # Eval mode (dropout = identity): check against a pure-JAX reference.
    out_eval = jax.block_until_ready(
        decoder_block(x, w_t, b, do_rate=do_rate, training=False))
    y_lin = x @ w_t + b[None, :]
    y_ref = jnp.where(y_lin >= 0, y_lin, 0.2 * y_lin)
    assert out_eval.shape == (B, out_dim)
    assert jnp.allclose(out_eval, y_ref, atol=1e-5, rtol=1e-5), "eval-mode mismatch"

    # Training mode: every output element must be either 0 (dropped) or
    # y_ref / keep_prob (kept, inverted scaling) -- matches nn.Dropout.
    keep_prob = 1.0 - do_rate
    out_train = jax.block_until_ready(
        decoder_block(x, w_t, b, do_rate=do_rate, training=True, rng_key=kd))
    assert out_train.shape == (B, out_dim)
    ok = jnp.isclose(out_train, 0.0, atol=1e-6) | jnp.isclose(
        out_train, y_ref / keep_prob, atol=1e-4, rtol=1e-4)
    assert bool(jnp.all(ok)), "training-mode dropout mismatch"

    print("KERNEL_OK")
</pallas_src>

<mosaic_0001>
module attributes {stable_mosaic.version = 11 : i64} {
  func.func @_decoder_block_eval_kernel(%arg0: i32, %arg1: i32, %arg2: memref<8x32xf32, #tpu.memory_space<vmem>>, %arg3: memref<32x128xf32, #tpu.memory_space<vmem>>, %arg4: memref<1x128xf32, #tpu.memory_space<vmem>>, %arg5: memref<8x128xf32, #tpu.memory_space<vmem>>) attributes {dimension_semantics = [#tpu.dimension_semantics<parallel>, #tpu.dimension_semantics<parallel>], iteration_bounds = array<i64: 1, 1>, scalar_prefetch = 0 : i64, scratch_operands = 0 : i64, tpu.core_type = #tpu.core_type<tc>, window_params = [{transform_indices = @transform_0, window_bounds = array<i64: 8, 32>}, {transform_indices = @transform_1, window_bounds = array<i64: 32, 128>}, {transform_indices = @transform_2, window_bounds = array<i64: 1, 128>}, {transform_indices = @transform_3, window_bounds = array<i64: 8, 128>}]} {
    %c0 = arith.constant 0 : index
    %c0_0 = arith.constant 0 : index
    %0 = vector.load %arg2[%c0, %c0_0] : memref<8x32xf32, #tpu.memory_space<vmem>>, vector<8x32xf32>
    %c0_1 = arith.constant 0 : index
    %c0_2 = arith.constant 0 : index
    %1 = vector.load %arg3[%c0_1, %c0_2] : memref<32x128xf32, #tpu.memory_space<vmem>>, vector<32x128xf32>
    %cst = arith.constant dense<0.000000e+00> : vector<8x128xf32>
    %2 = tpu.matmul %0, %1, %cst {dimension_numbers = #tpu.dot_dimension_numbers<[1], [0], [0], [1], [0, 0, 1, 1], [], []>} : vector<8x32xf32>, vector<32x128xf32>, vector<8x128xf32> -> vector<8x128xf32>
    %c0_3 = arith.constant 0 : index
    %c0_4 = arith.constant 0 : index
    %3 = vector.load %arg4[%c0_3, %c0_4] : memref<1x128xf32, #tpu.memory_space<vmem>>, vector<1x128xf32>
    %4 = vector.broadcast %3 : vector<1x128xf32> to vector<8x128xf32>
    %5 = arith.addf %2, %4 : vector<8x128xf32>
    %cst_5 = arith.constant 0.000000e+00 : f32
    %6 = vector.broadcast %cst_5 : f32 to vector<8x128xf32>
    %7 = arith.cmpf oge, %5, %6 : vector<8x128xf32>
    %cst_6 = arith.constant 2.000000e-01 : f32
    %8 = vector.broadcast %cst_6 : f32 to vector<8x128xf32>
    %9 = arith.mulf %8, %5 : vector<8x128xf32>
    %10 = arith.select %7, %5, %9 : vector<8x128xi1>, vector<8x128xf32>
    %c0_7 = arith.constant 0 : index
    %c0_8 = arith.constant 0 : index
    %11 = vector.load %arg5[%c0_7, %c0_8] : memref<8x128xf32, #tpu.memory_space<vmem>>, vector<8x128xf32>
    tpu.vector_store %arg5[%c0_7, %c0_8], %10 {strides = array<i32>} : memref<8x128xf32, #tpu.memory_space<vmem>>, vector<8x128xf32>,
    return
  }
  func.func @transform_0(%arg0: i32, %arg1: i32) -> (i32, i32) {
    %c0_i32 = arith.constant 0 : i32
    %c0_i32_0 = arith.constant 0 : i32
    return %arg1, %c0_i32 : i32, i32
  }
  func.func @transform_1(%arg0: i32, %arg1: i32) -> (i32, i32) {
    %c0_i32 = arith.constant 0 : i32
    %c0_i32_0 = arith.constant 0 : i32
    return %c0_i32, %arg0 : i32, i32
  }
  func.func @transform_2(%arg0: i32, %arg1: i32) -> (i32, i32) {
    %c0_i32 = arith.constant 0 : i32
    %c0_i32_0 = arith.constant 0 : i32
    return %c0_i32, %arg0 : i32, i32
  }
  func.func @transform_3(%arg0: i32, %arg1: i32) -> (i32, i32) {
    %c0_i32 = arith.constant 0 : i32
    return %arg1, %arg0 : i32, i32
  }
}

</mosaic_0001>

<bundles_post_ra>
// kernel: tpu_custom_call.1
= control target key start
LH: loop header
LB: loop body
LE: loop exit
PB: predicated region body
PF: predicated region fallthrough
CT: control target
= control target key end

     0   :  { %8 = vsyncpa [#allocation3], 0  ;;  %s325_s0 = inlined_call_operand.hbm [shape: f32[8,32], index: 0, kind: input, shape index: {}]   ;;  %s326_s1 = inlined_call_operand.hbm [shape: f32[32,128], index: 1, kind: input, shape index: {}]   ;;  %s327_s2 = inlined_call_operand.vmem [shape: f32[1,128], index: 2, kind: input, shape index: {}]   ;;  %s328_s3 = inlined_call_operand.hbm [shape: f32[8,128], index: 3, kind: output, shape index: {}]  }
   0x1   :  { %9 = vsyncpa [#allocation6], 0 }
   0x2   :  { %10 = vsyncpa [#allocation4], 0  ;;  %s251_s12 = smov [#allocation2]   ;;  %s252_s14 = smov [#allocation5]  }
   0x3   :  { %s17_s13 = sshll.u32 %s251_s12, 4  ;;  %s26_s15 = sshll.u32 %s252_s14, 4  ;;  %s18_s13 = int_to_ptr.vmem [resolvable:$true] %s17_s13  ;;  %s279_s15 = int_to_ptr.vmem [resolvable:$true] %s26_s15 }
   0x4   :  { %s179_s18 = scalar_lea.hbm %s325_s0, 128 }
   0x5   :  { %p180_p0 = scmp.ne.s32.totalorder %s325_s0, %s179_s18  ;;  %p183_p1 = scmp.lt.u32.totalorder %s179_s18, %s325_s0 }
   0x7   :  { %p185_p2 = pnand %p183_p1, %p180_p0 }
   0x9   :  { %188 = shalt.err (!%p185_p2)
}
   0xa   :  { %s189_s23 = scalar_lea.vmem %s18_s13, 128  ;;  %p194_p4 = scmp.lt.s32.totalorder %s18_s13, %s18_s13 }
   0xb   :  { %p190_p3 = scmp.ne.s32.totalorder %s18_s13, %s189_s23  ;;  %p195_p5 = scmp.lt.s32.totalorder %s189_s23, %s189_s23 }
   0xd   :  { %p196_p6 = por %p195_p5, %p194_p4 }
   0xf   :  { %p197_p7 = pnand %p196_p6, %p190_p3 }
  0x11   :  { %200 = shalt.err (!%p197_p7)
}
  0x12   :  { %20 = dma.hbm_to_vmem [thread:$0]  %s325_s0, 128, %s18_s13, [#allocation3]  }
  0x13   :  { %s201_s28 = scalar_lea.hbm %s326_s1, 512 }
  0x14   :  { %p202_p8 = scmp.ne.s32.totalorder %s326_s1, %s201_s28  ;;  %p205_p9 = scmp.lt.u32.totalorder %s201_s28, %s326_s1 }
  0x16   :  { %p207_p10 = pnand %p205_p9, %p202_p8 }
  0x18   :  { %210 = shalt.err (!%p207_p10)
}
  0x19   :  { %s211_s6 = scalar_lea.vmem %s279_s15, 512  ;;  %p216_p12 = scmp.lt.s32.totalorder %s279_s15, %s279_s15 }
  0x1a   :  { %p212_p11 = scmp.ne.s32.totalorder %s279_s15, %s211_s6  ;;  %p217_p13 = scmp.lt.s32.totalorder %s211_s6, %s211_s6 }
  0x1c   :  { %p218_p0 = por %p217_p13, %p216_p12 }
  0x1e   :  { %p219_p1 = pnand %p218_p0, %p212_p11 }
  0x20   :  { %222 = shalt.err (!%p219_p1)
}
  0x21   :  { %s253_s0 = smov 128   ;;  %s254_s7 = smov 8  }
  0x22   :  { %32 = dma.hbm_to_vmem [thread:$0]  %s326_s1, 512, %s279_s15, [#allocation6], %s253_s0, %s253_s0, %s254_s7  }
  0x23   :  { %245 = dma.done.wait [#allocation3], 128  }
  0x24   :  { %246 = vsyncadd [#allocation3], 4294967168 }
  0x25   :  { %247 = dma.done.wait [#allocation6], 512  }
  0x26   :  { %248 = vsyncadd [#allocation6], 4294966784  ;;  %v255_v0 = vmov 0.0|0.0   ;;  %vm256_vm0 = vmmov 0   ;;  %v257_v1 = vmov 0.0   ;;  %v42_v2 = vld [vmem:[#allocation5] sm:$0xff] }
  0x27   :  { %165 = vmatprep.subr.bf16.mxu0 %v255_v0  ;;  %162 = vmatprep.mubr.msk.f32.mxu0 %vm256_vm0, %v257_v1  ;;  %v43_v3 = vld [vmem:[#allocation5 + $0x8] sm:$0xff]  ;;  %v44_v4 = vld [vmem:[#allocation5 + $0x10] sm:$0xff]  ;;  %v45_v6 = vld [vmem:[#allocation5 + $0x18] sm:$0xff]  ;;  %vm53_vm1 = vcmask 261120   ;;  %s258_s11 = smov [#allocation7]  }
  0x28   :  { %v166_v5 = vpack.c.bf16 %v43_v3, %v42_v2  ;;  %v169_v7 = vpack.c.bf16 %v45_v6, %v44_v4  ;;  %v41_v8 = vld [vmem:[#allocation2] sm:$0xff]  ;;  %s137_s12 = sshll.u32 %s258_s11, 4  ;;  %s138_s12 = int_to_ptr.vmem [resolvable:$true] %s137_s12 }
  0x29   :  { %v147_v9 = vld [vmem:[%s327_s2] ss:$0 sm:$0xff]  ;;  %s223_s13 = scalar_lea.vmem %s138_s12, 128  ;;  %p228_p3 = scmp.lt.s32.totalorder %s138_s12, %s138_s12 }
  0x2a   :  { %167 = vmatpush3.bf16.msra.mxu0 %v166_v5  ;;  %p224_p2 = scmp.ne.s32.totalorder %s138_s12, %s223_s13  ;;  %p229_p4 = scmp.lt.s32.totalorder %s223_s13, %s223_s13 }
  0x2b   :  { %168 = vmatprep.subr.bf16.mxu0 %v255_v0 }
  0x2c   :  { %p230_p5 = por %p229_p4, %p228_p3 }
  0x2e   :  { %170 = vmatpush3.bf16.msra.mxu0 %v169_v7  ;;  %p231_p6 = pnand %p230_p5, %p224_p2 }
  0x31   :  { %163 = vmatmul.mubr.msk.f32.vlgmr.msra.gmra.mrb[0].mxu0 %vm53_vm1, %v41_v8 }
 0x104   :  { %v123_v10 = vpop.f32.mrb[0].mxu0 }
 0x105   :  { %v124_v11 = vadd.f32 %v147_v9, %v123_v10  ;;  %v164_v12 = vpop.f32.mrb[1].mxu0 }
 0x107   :  { %v128_v13 = vmul.f32 0.2, %v124_v11  ;;  %vm127_vm2 = vcmp.ge.f32.partialorder %v124_v11, 0.0 }
 0x109   :  { %v129_v14 = vsel %vm127_vm2, %v124_v11, %v128_v13 }
 0x10a   :  { %130 = vst [vmem:[#allocation7] sm:$0xff] %v129_v14 }
 0x10b   :  { %234 = shalt.err (!%p231_p6)
}
 0x10c   :  { %s235_s2 = scalar_lea.hbm %s328_s3, 128 }
 0x10d   :  { %p236_p7 = scmp.ne.s32.totalorder %s328_s3, %s235_s2  ;;  %p239_p8 = scmp.lt.u32.totalorder %s235_s2, %s328_s3 }
 0x10f   :  { %p241_p9 = pnand %p239_p8, %p236_p7 }
 0x111   :  { %244 = shalt.err (!%p241_p9)
}
 0x112   :  { %140 = dma.vmem_to_hbm [thread:$0]  %s138_s12, 128, %s328_s3, [#allocation4]  }
 0x113   :  { %249 = dma.done.wait [#allocation4], 128  }
 0x114   :  { %250 = vsyncadd [#allocation4], 4294967168 }
 0x115   :  { %144 = vsyncpa [#allocation3], 1 }
 0x116   :  { %145 = vsyncpa [#allocation6], 1 }
 0x117   :  { %146 = vsyncpa [#allocation4], 1 }

</bundles_post_ra>
